<compile_context>
chip_gen: v6e
topology: v6e:2x2x1
jax: 0.10.0
libtpu: 0.0.40
codegen_flags: <defaults>
</compile_context>

<pallas_src>
import functools

import numpy as np
import jax
import jax.numpy as jnp
from jax import lax
from jax.experimental import pallas as pl
from jax.experimental.pallas import tpu as pltpu

NCORES = 2                      # leading "parallel" grid axis (both TCs on v7x)
LANE = 128
TARGET_TILE_ELEMS = 8 * 32768   # ~1 MiB f32 logits tile per pipeline buffer


def _round_up(x, m):
    return ((x + m - 1) // m) * m


# ---------------------------------------------------------------------------
# Weighted cross-entropy (torch nn.CrossEntropyLoss(weight=w), reduction=mean)
# Channel-major layout: logits (C, M_pad), targets (1, M_pad).
# ---------------------------------------------------------------------------
def _ce_kernel(logits_ref, tgt_ref, w_ref, nll_out_ref, w_out_ref,
               nll_acc, w_acc):
    si = pl.program_id(1)                    # reduction axis (innermost)

    @pl.when(si == 0)
    def _():
        nll_acc[...] = jnp.zeros_like(nll_acc)
        w_acc[...] = jnp.zeros_like(w_acc)

    x = logits_ref[...].astype(jnp.float32)              # (C, tn)  lane-dense
    t = tgt_ref[...]                                     # (1, tn)  int32
    c, tn = x.shape

    # one-hot over the class (sublane) axis; all-zero for padded/ignored t < 0
    cls = lax.broadcasted_iota(jnp.int32, (c, tn), 0)
    onehot = (cls == t).astype(jnp.float32)              # (C, tn)

    # numerically stable log-sum-exp over classes (sublane reduce, EUP exp/log)
    m = jnp.max(x, axis=0, keepdims=True)                                  # (1, tn)
    lse = m + jnp.log(jnp.sum(jnp.exp(x - m), axis=0, keepdims=True))      # (1, tn)
    picked = jnp.sum(x * onehot, axis=0, keepdims=True)                    # (1, tn)
    w_pt = jnp.sum(w_ref[...] * onehot, axis=0, keepdims=True)             # (1, tn)

    # wide per-lane accumulators; scalar reduce only at the final step
    nll_acc[...] += w_pt * (lse - picked)
    w_acc[...] += w_pt

    @pl.when(si == pl.num_programs(1) - 1)
    def _():
        nll_out_ref[...] = jnp.sum(nll_acc[...], axis=1,
                                   keepdims=True).reshape(1, 1, 1)
        w_out_ref[...] = jnp.sum(w_acc[...], axis=1,
                                 keepdims=True).reshape(1, 1, 1)


def weighted_cross_entropy(logits_flat, targets_flat, class_weights):
    """logits_flat: (M, C) float (native dtype), targets_flat: (M,) int,
    class_weights: (C,) float. Returns scalar weighted-mean cross entropy."""
    m_total, c = logits_flat.shape
    c_pad = _round_up(c, 8)

    # Column tile: as large as a ~1 MiB sublane-padded logits buffer allows.
    tn_max = max(LANE, (TARGET_TILE_ELEMS // c_pad) // LANE * LANE)
    cols_per_core = _round_up(max(1, -(-m_total // NCORES)), LANE)
    tn = min(tn_max, cols_per_core)
    steps = -(-cols_per_core // tn)
    cols_per_core = steps * tn
    m_pad = NCORES * cols_per_core
    pad = m_pad - m_total

    # Pad the point axis (target -1 -> zero weight -> excluded from both sums)
    # and go channel-major.  Native dtype is kept; the kernel casts to f32.
    logits_cm = jnp.pad(logits_flat, ((0, pad), (0, 0))).T           # (C, m_pad)
    targets_p = jnp.pad(targets_flat.astype(jnp.int32), (0, pad),
                        constant_values=-1).reshape(1, m_pad)        # (1, m_pad)
    w_col = class_weights.astype(jnp.float32).reshape(c, 1)          # (C, 1)

    nll_sums, w_sums = pl.pallas_call(
        _ce_kernel,
        out_shape=(jax.ShapeDtypeStruct((NCORES, 1, 1), jnp.float32),
                   jax.ShapeDtypeStruct((NCORES, 1, 1), jnp.float32)),
        grid=(NCORES, steps),
        in_specs=[
            pl.BlockSpec((c, tn), lambda ci, si: (0, ci * steps + si)),
            pl.BlockSpec((1, tn), lambda ci, si: (0, ci * steps + si)),
            pl.BlockSpec((c, 1), lambda ci, si: (0, 0)),     # weights (resident)
        ],
        out_specs=(pl.BlockSpec((1, 1, 1), lambda ci, si: (ci, 0, 0)),
                   pl.BlockSpec((1, 1, 1), lambda ci, si: (ci, 0, 0))),
        scratch_shapes=[pltpu.VMEM((1, tn), jnp.float32),
                        pltpu.VMEM((1, tn), jnp.float32)],
        compiler_params=pltpu.CompilerParams(
            dimension_semantics=("parallel", "arbitrary"),
            vmem_limit_bytes=48 * 1024 * 1024),
    )(logits_cm, targets_p, w_col)

    # Combine the per-core partials (2 elements each) in plain JAX.
    return jnp.sum(nll_sums) / jnp.sum(w_sums)


# ---------------------------------------------------------------------------
# T-Net orthogonality regularizer:  mean_b || T_b T_b^T - I ||_F^2
# Single-step kernel over the whole (B, D, D) tensor.
# ---------------------------------------------------------------------------
def _tnet_reg_kernel(t_ref, out_ref, *, inv_batch):
    t = t_ref[...].astype(jnp.float32)                          # (B, D, D)
    d = t.shape[-1]
    # Batched T @ T^T on the MXU (contract the last axis of both operands).
    aat = lax.dot_general(t, t, (((2,), (2,)), ((0,), (0,))),
                          preferred_element_type=jnp.float32)   # (B, D, D)
    # ||T T^T - I||_F^2 = ||T T^T||_F^2 - 2 ||T||_F^2 + D
    sq = (jnp.sum(aat * aat, axis=2, keepdims=True)
          - 2.0 * jnp.sum(t * t, axis=2, keepdims=True))        # (B, D, 1)
    per_b = jnp.sum(sq, axis=1, keepdims=True)                  # (B, 1, 1)
    total = jnp.sum(per_b, axis=0, keepdims=True)               # (1, 1, 1)
    out_ref[...] = total[:, 0, :] * inv_batch + float(d)


def tnet_orthogonality_reg(transform):
    """transform: (B, D, D) -> scalar mean over batch of ||T T^T - I||_F^2."""
    b, d, _ = transform.shape
    out = pl.pallas_call(
        functools.partial(_tnet_reg_kernel, inv_batch=1.0 / float(b)),
        out_shape=jax.ShapeDtypeStruct((1, 1), jnp.float32),
    )(transform)
    return out[0, 0]


# ---------------------------------------------------------------------------
# Module-equivalent wrapper
# ---------------------------------------------------------------------------
class PointNetSegLoss:
    """Pallas-TPU equivalent of the PyTorch PointNetSegLoss module (forward)."""

    def __init__(self, alpha=None, reg_weight=0.001):
        self.reg_weight = float(reg_weight)
        if isinstance(alpha, (float, int)) and not isinstance(alpha, bool):
            self.class_weights = jnp.asarray([alpha, 1.0 - alpha], jnp.float32)
        elif isinstance(alpha, (list, tuple, np.ndarray)):
            self.class_weights = jnp.asarray(alpha, jnp.float32)
        else:
            self.class_weights = None   # uniform weights -> plain mean CE

    def __call__(self, logits, targets, transform_matrix=None):
        """logits: (B, N, C), targets: (B, N) int, transform_matrix: (B, D, D) or None."""
        b, n, c = logits.shape
        w = (self.class_weights if self.class_weights is not None
             else jnp.ones((c,), jnp.float32))
        ce = weighted_cross_entropy(logits.reshape(b * n, c),
                                    targets.reshape(b * n),
                                    w)
        if transform_matrix is None:
            return ce
        reg = tnet_orthogonality_reg(transform_matrix)
        return ce + self.reg_weight * reg


# ---------------------------------------------------------------------------
if __name__ == "__main__":
    B, N, NUM_CLASSES, D = 2, 16, 4, 64

    key = jax.random.PRNGKey(0)
    k1, k2, k3 = jax.random.split(key, 3)
    logits = jax.random.normal(k1, (B, N, NUM_CLASSES), jnp.float32)
    targets = jax.random.randint(k2, (B, N), 0, NUM_CLASSES, jnp.int32)
    transform = (jnp.eye(D, dtype=jnp.float32)[None]
                 + 0.05 * jax.random.normal(k3, (B, D, D), jnp.float32))

    alpha = [0.4, 0.3, 0.2, 0.1]                 # per-class weights (torch `weight=`)
    reg_weight = 0.001
    loss_fn = PointNetSegLoss(alpha=alpha, reg_weight=reg_weight)

    total = jax.jit(loss_fn.__call__)(logits, targets, transform)
    total = jax.block_until_ready(total)

    # Pure-JAX reference (same math as torch CrossEntropyLoss(weight) + reg term).
    logp = jax.nn.log_softmax(logits, axis=-1)
    nll_ref = -jnp.take_along_axis(logp, targets[..., None], axis=-1)[..., 0]
    w_ref = jnp.asarray(alpha, jnp.float32)[targets]
    ce_ref = jnp.sum(w_ref * nll_ref) / jnp.sum(w_ref)
    aat_ref = jnp.einsum("bij,bkj->bik", transform, transform)
    reg_ref = jnp.mean(jnp.sum((aat_ref - jnp.eye(D)) ** 2, axis=(1, 2)))
    ref = ce_ref + reg_weight * reg_ref

    assert bool(jnp.isfinite(total)), total
    assert abs(float(total) - float(ref)) < 1e-4 * max(1.0, abs(float(ref))), (
        float(total), float(ref))
    print("KERNEL_OK")
</pallas_src>

<mosaic_0001>
module attributes {stable_mosaic.version = 11 : i64} {
  func.func @_tnet_reg_kernel(%arg0: memref<2x64x64xf32, #tpu.memory_space<vmem>>, %arg1: memref<1x1xf32, #tpu.memory_space<vmem>>) attributes {dimension_semantics = [], scalar_prefetch = 0 : i64, scratch_operands = 0 : i64, tpu.core_type = #tpu.core_type<tc>} {
    %c0 = arith.constant 0 : index
    %c0_0 = arith.constant 0 : index
    %c0_1 = arith.constant 0 : index
    %0 = vector.load %arg0[%c0, %c0_0, %c0_1] : memref<2x64x64xf32, #tpu.memory_space<vmem>>, vector<2x64x64xf32>
    %cst = arith.constant dense<0.000000e+00> : vector<2x64x64xf32>
    %1 = tpu.matmul %0, %0, %cst {dimension_numbers = #tpu.dot_dimension_numbers<[2], [2], [1], [1], [0, 0, 0, 1, 1, 1], [0], [0]>} : vector<2x64x64xf32>, vector<2x64x64xf32>, vector<2x64x64xf32> -> vector<2x64x64xf32>
    %2 = arith.mulf %1, %1 : vector<2x64x64xf32>
    %cst_2 = arith.constant dense<0.000000e+00> : vector<2x64xf32>
    %3 = vector.multi_reduction <add>, %2, %cst_2 [2] : vector<2x64x64xf32> to vector<2x64xf32>
    %4 = vector.shape_cast %3 : vector<2x64xf32> to vector<2x64x1xf32>
    %5 = arith.mulf %0, %0 : vector<2x64x64xf32>
    %cst_3 = arith.constant dense<0.000000e+00> : vector<2x64xf32>
    %6 = vector.multi_reduction <add>, %5, %cst_3 [2] : vector<2x64x64xf32> to vector<2x64xf32>
    %7 = vector.shape_cast %6 : vector<2x64xf32> to vector<2x64x1xf32>
    %cst_4 = arith.constant 2.000000e+00 : f32
    %8 = vector.broadcast %cst_4 : f32 to vector<2x64x1xf32>
    %9 = arith.mulf %8, %7 : vector<2x64x1xf32>
    %10 = arith.subf %4, %9 : vector<2x64x1xf32>
    %cst_5 = arith.constant dense<0.000000e+00> : vector<2x1xf32>
    %11 = vector.multi_reduction <add>, %10, %cst_5 [1] : vector<2x64x1xf32> to vector<2x1xf32>
    %12 = vector.shape_cast %11 : vector<2x1xf32> to vector<2x1x1xf32>
    %cst_6 = arith.constant dense<0.000000e+00> : vector<1x1xf32>
    %13 = vector.multi_reduction <add>, %12, %cst_6 [0] : vector<2x1x1xf32> to vector<1x1xf32>
    %14 = vector.shape_cast %13 : vector<1x1xf32> to vector<1x1x1xf32>
    %15 = vector.shape_cast %14 : vector<1x1x1xf32> to vector<1x1xf32>
    %cst_7 = arith.constant 5.000000e-01 : f32
    %16 = vector.broadcast %cst_7 : f32 to vector<1x1xf32>
    %17 = arith.mulf %15, %16 : vector<1x1xf32>
    %cst_8 = arith.constant 6.400000e+01 : f32
    %18 = vector.broadcast %cst_8 : f32 to vector<1x1xf32>
    %19 = arith.addf %17, %18 : vector<1x1xf32>
    %c0_9 = arith.constant 0 : index
    %c0_10 = arith.constant 0 : index
    %20 = vector.load %arg1[%c0_9, %c0_10] : memref<1x1xf32, #tpu.memory_space<vmem>>, vector<1x1xf32>
    tpu.vector_store %arg1[%c0_9, %c0_10], %19 {strides = array<i32>} : memref<1x1xf32, #tpu.memory_space<vmem>>, vector<1x1xf32>,
    return
  }
}

module attributes {stable_mosaic.version = 11 : i64} {
  func.func @_ce_kernel(%arg0: i32, %arg1: i32, %arg2: memref<4x128xf32, #tpu.memory_space<vmem>>, %arg3: memref<1x128xi32, #tpu.memory_space<vmem>>, %arg4: memref<4x1xf32, #tpu.memory_space<vmem>>, %arg5: memref<1x1x1xf32, #tpu.memory_space<vmem>>, %arg6: memref<1x1x1xf32, #tpu.memory_space<vmem>>, %arg7: memref<1x128xf32, #tpu.memory_space<vmem>>, %arg8: memref<1x128xf32, #tpu.memory_space<vmem>>) attributes {dimension_semantics = [#tpu.dimension_semantics<parallel>, #tpu.dimension_semantics<arbitrary>], iteration_bounds = array<i64: 2, 1>, scalar_prefetch = 0 : i64, scratch_operands = 2 : i64, tpu.core_type = #tpu.core_type<tc>, window_params = [{transform_indices = @transform_0, window_bounds = array<i64: 4, 128>}, {transform_indices = @transform_1, window_bounds = array<i64: 1, 128>}, {pipeline_mode = #tpu.pipeline_mode<synchronous>, transform_indices = @transform_2, window_bounds = array<i64: 4, 1>}, {transform_indices = @transform_3, window_bounds = array<i64: 1, 1, 1>}, {transform_indices = @transform_4, window_bounds = array<i64: 1, 1, 1>}]} {
    %c0_i32 = arith.constant 0 : i32
    %0 = arith.cmpi eq, %arg1, %c0_i32 : i32
    %1 = arith.extui %0 : i1 to i32
    %c0_i32_0 = arith.constant 0 : i32
    %2 = arith.cmpi ne, %1, %c0_i32_0 : i32
    scf.if %2 {
      %cst_19 = arith.constant 0.000000e+00 : f32
      %38 = vector.broadcast %cst_19 : f32 to vector<1x128xf32>
      %c0_20 = arith.constant 0 : index
      %c0_21 = arith.constant 0 : index
      %39 = vector.load %arg7[%c0_20, %c0_21] : memref<1x128xf32, #tpu.memory_space<vmem>>, vector<1x128xf32>
      tpu.vector_store %arg7[%c0_20, %c0_21], %38 {strides = array<i32>} : memref<1x128xf32, #tpu.memory_space<vmem>>, vector<1x128xf32>,
      %cst_22 = arith.constant 0.000000e+00 : f32
      %40 = vector.broadcast %cst_22 : f32 to vector<1x128xf32>
      %c0_23 = arith.constant 0 : index
      %c0_24 = arith.constant 0 : index
      %41 = vector.load %arg8[%c0_23, %c0_24] : memref<1x128xf32, #tpu.memory_space<vmem>>, vector<1x128xf32>
      tpu.vector_store %arg8[%c0_23, %c0_24], %40 {strides = array<i32>} : memref<1x128xf32, #tpu.memory_space<vmem>>, vector<1x128xf32>,
    } else {
    }
    %c0 = arith.constant 0 : index
    %c0_1 = arith.constant 0 : index
    %3 = vector.load %arg2[%c0, %c0_1] : memref<4x128xf32, #tpu.memory_space<vmem>>, vector<4x128xf32>
    %c0_2 = arith.constant 0 : index
    %c0_3 = arith.constant 0 : index
    %4 = vector.load %arg3[%c0_2, %c0_3] : memref<1x128xi32, #tpu.memory_space<vmem>>, vector<1x128xi32>
    %5 = tpu.iota {dimensions = array<i32: 0>} : vector<4x128xi32>
    %6 = vector.broadcast %4 : vector<1x128xi32> to vector<4x128xi32>
    %7 = arith.cmpi eq, %5, %6 : vector<4x128xi32>
    %8 = arith.extui %7 : vector<4x128xi1> to vector<4x128xi32>
    %9 = arith.sitofp %8 : vector<4x128xi32> to vector<4x128xf32>
    %cst = arith.constant dense<0xFF800000> : vector<128xf32>
    %10 = vector.multi_reduction <maximumf>, %3, %cst [0] : vector<4x128xf32> to vector<128xf32>
    %11 = vector.shape_cast %10 : vector<128xf32> to vector<1x128xf32>
    %12 = vector.broadcast %11 : vector<1x128xf32> to vector<4x128xf32>
    %13 = arith.subf %3, %12 : vector<4x128xf32>
    %14 = math.exp %13 : vector<4x128xf32>
    %cst_4 = arith.constant dense<0.000000e+00> : vector<128xf32>
    %15 = vector.multi_reduction <add>, %14, %cst_4 [0] : vector<4x128xf32> to vector<128xf32>
    %16 = vector.shape_cast %15 : vector<128xf32> to vector<1x128xf32>
    %17 = math.log %16 : vector<1x128xf32>
    %18 = arith.addf %11, %17 : vector<1x128xf32>
    %19 = arith.mulf %3, %9 : vector<4x128xf32>
    %cst_5 = arith.constant dense<0.000000e+00> : vector<128xf32>
    %20 = vector.multi_reduction <add>, %19, %cst_5 [0] : vector<4x128xf32> to vector<128xf32>
    %21 = vector.shape_cast %20 : vector<128xf32> to vector<1x128xf32>
    %c0_6 = arith.constant 0 : index
    %c0_7 = arith.constant 0 : index
    %22 = vector.load %arg4[%c0_6, %c0_7] : memref<4x1xf32, #tpu.memory_space<vmem>>, vector<4x1xf32>
    %23 = vector.broadcast %22 : vector<4x1xf32> to vector<4x128xf32>
    %24 = arith.mulf %23, %9 : vector<4x128xf32>
    %cst_8 = arith.constant dense<0.000000e+00> : vector<128xf32>
    %25 = vector.multi_reduction <add>, %24, %cst_8 [0] : vector<4x128xf32> to vector<128xf32>
    %26 = vector.shape_cast %25 : vector<128xf32> to vector<1x128xf32>
    %c0_9 = arith.constant 0 : index
    %c0_10 = arith.constant 0 : index
    %27 = vector.load %arg7[%c0_9, %c0_10] : memref<1x128xf32, #tpu.memory_space<vmem>>, vector<1x128xf32>
    %28 = arith.subf %18, %21 : vector<1x128xf32>
    %29 = arith.mulf %26, %28 : vector<1x128xf32>
    %30 = arith.addf %27, %29 : vector<1x128xf32>
    %c0_11 = arith.constant 0 : index
    %c0_12 = arith.constant 0 : index
    %31 = vector.load %arg7[%c0_11, %c0_12] : memref<1x128xf32, #tpu.memory_space<vmem>>, vector<1x128xf32>
    tpu.vector_store %arg7[%c0_11, %c0_12], %30 {strides = array<i32>} : memref<1x128xf32, #tpu.memory_space<vmem>>, vector<1x128xf32>,
    %c0_13 = arith.constant 0 : index
    %c0_14 = arith.constant 0 : index
    %32 = vector.load %arg8[%c0_13, %c0_14] : memref<1x128xf32, #tpu.memory_space<vmem>>, vector<1x128xf32>
    %33 = arith.addf %32, %26 : vector<1x128xf32>
    %c0_15 = arith.constant 0 : index
    %c0_16 = arith.constant 0 : index
    %34 = vector.load %arg8[%c0_15, %c0_16] : memref<1x128xf32, #tpu.memory_space<vmem>>, vector<1x128xf32>
    tpu.vector_store %arg8[%c0_15, %c0_16], %33 {strides = array<i32>} : memref<1x128xf32, #tpu.memory_space<vmem>>, vector<1x128xf32>,
    %c0_i32_17 = arith.constant 0 : i32
    %35 = arith.cmpi eq, %arg1, %c0_i32_17 : i32
    %36 = arith.extui %35 : i1 to i32
    %c0_i32_18 = arith.constant 0 : i32
    %37 = arith.cmpi ne, %36, %c0_i32_18 : i32
    scf.if %37 {
      %c0_19 = arith.constant 0 : index
      %c0_20 = arith.constant 0 : index
      %38 = vector.load %arg7[%c0_19, %c0_20] : memref<1x128xf32, #tpu.memory_space<vmem>>, vector<1x128xf32>
      %cst_21 = arith.constant dense<0.000000e+00> : vector<1xf32>
      %39 = vector.multi_reduction <add>, %38, %cst_21 [1] : vector<1x128xf32> to vector<1xf32>
      %40 = vector.shape_cast %39 : vector<1xf32> to vector<1x1xf32>
      %41 = vector.shape_cast %40 : vector<1x1xf32> to vector<1x1x1xf32>
      %c0_22 = arith.constant 0 : index
      %c0_23 = arith.constant 0 : index
      %c0_24 = arith.constant 0 : index
      %42 = vector.load %arg5[%c0_22, %c0_23, %c0_24] : memref<1x1x1xf32, #tpu.memory_space<vmem>>, vector<1x1x1xf32>
      tpu.vector_store %arg5[%c0_22, %c0_23, %c0_24], %41 {strides = array<i32>} : memref<1x1x1xf32, #tpu.memory_space<vmem>>, vector<1x1x1xf32>,
      %c0_25 = arith.constant 0 : index
      %c0_26 = arith.constant 0 : index
      %43 = vector.load %arg8[%c0_25, %c0_26] : memref<1x128xf32, #tpu.memory_space<vmem>>, vector<1x128xf32>
      %cst_27 = arith.constant dense<0.000000e+00> : vector<1xf32>
      %44 = vector.multi_reduction <add>, %43, %cst_27 [1] : vector<1x128xf32> to vector<1xf32>
      %45 = vector.shape_cast %44 : vector<1xf32> to vector<1x1xf32>
      %46 = vector.shape_cast %45 : vector<1x1xf32> to vector<1x1x1xf32>
      %c0_28 = arith.constant 0 : index
      %c0_29 = arith.constant 0 : index
      %c0_30 = arith.constant 0 : index
      %47 = vector.load %arg6[%c0_28, %c0_29, %c0_30] : memref<1x1x1xf32, #tpu.memory_space<vmem>>, vector<1x1x1xf32>
      tpu.vector_store %arg6[%c0_28, %c0_29, %c0_30], %46 {strides = array<i32>} : memref<1x1x1xf32, #tpu.memory_space<vmem>>, vector<1x1x1xf32>,
    } else {
    }
    return
  }
  func.func @transform_0(%arg0: i32, %arg1: i32) -> (i32, i32) {
    %c1_i32 = arith.constant 1 : i32
    %0 = arith.muli %arg0, %c1_i32 : i32
    %1 = arith.addi %0, %arg1 : i32
    %c0_i32 = arith.constant 0 : i32
    %c0_i32_0 = arith.constant 0 : i32
    return %c0_i32, %1 : i32, i32
  }
  func.func @transform_1(%arg0: i32, %arg1: i32) -> (i32, i32) {
    %c1_i32 = arith.constant 1 : i32
    %0 = arith.muli %arg0, %c1_i32 : i32
    %1 = arith.addi %0, %arg1 : i32
    %c0_i32 = arith.constant 0 : i32
    %c0_i32_0 = arith.constant 0 : i32
    return %c0_i32, %1 : i32, i32
  }
  func.func @transform_2(%arg0: i32, %arg1: i32) -> (i32, i32) {
    %c0_i32 = arith.constant 0 : i32
    %c0_i32_0 = arith.constant 0 : i32
    %c0_i32_1 = arith.constant 0 : i32
    return %c0_i32, %c0_i32_0 : i32, i32
  }
  func.func @transform_3(%arg0: i32, %arg1: i32) -> (i32, i32, i32) {
    %c0_i32 = arith.constant 0 : i32
    %c0_i32_0 = arith.constant 0 : i32
    %c0_i32_1 = arith.constant 0 : i32
    return %arg0, %c0_i32, %c0_i32_0 : i32, i32, i32
  }
  func.func @transform_4(%arg0: i32, %arg1: i32) -> (i32, i32, i32) {
    %c0_i32 = arith.constant 0 : i32
    %c0_i32_0 = arith.constant 0 : i32
    %c0_i32_1 = arith.constant 0 : i32
    return %arg0, %c0_i32, %c0_i32_0 : i32, i32, i32
  }
}

</mosaic_0001>

<bundles_post_ra>
// kernel: a_call__.2
= control target key start
LH: loop header
LB: loop body
LE: loop exit
PB: predicated region body
PF: predicated region fallthrough
CT: control target
= control target key end

     0   :  { %s504_s15 = smov 0   ;;  %s506_s16 = smov 0   ;;  %s556_s0 = inlined_call_operand.vmem [shape: f32[4,256], index: 0, kind: input, shape index: {}]   ;;  %s557_s1 = inlined_call_operand.vmem [shape: s32[1,256], index: 1, kind: input, shape index: {}]   ;;  %s558_s2 = inlined_call_operand.vmem [shape: f32[4,1], index: 2, kind: input, shape index: {}]   ;;  %s559_s3 = inlined_call_operand.vmem [shape: f32[2,1,1], index: 3, kind: output, shape index: {0}]   ;;  %s560_s4 = inlined_call_operand.vmem [shape: f32[2,1,1], index: 4, kind: output, shape index: {1}]  }
   0x1   :  { %s508_s17 = smov 0  }
   0x2 LB: > { %s27_s18 = sadd.s32 1, %s471_s16  ;;  %p416_p0 = scmp.ge.s32.totalorder %s475_s17, 1  ;;  %s475_s17 = sphi %s508_s17, %s15_s17   ;;  %s471_s16 = sphi %s506_s16, %s562_s16   ;;  %s467_s15 = sphi %s504_s15, %s561_s15  }
   0x3   : > { %p29_p1 = scmp.ge.s32.totalorder %s27_s18, 2  ;;  %p192_p2 = scmp.lt.s32.totalorder %s475_s17, 3 }
   0x5   : > { %s564_s18 = smov (%p29_p1, %s27_s18), 0  ;;  %p193_p3 = pnand %p416_p0, %p192_p2 }
   0x6   : > { %p224_p4 = scmp.lt.s32.totalorder (!%p193_p3), %s467_s15, 1 }
   0x7   : > { %196 = sbr.rel (%p193_p3) target bundleno = 305 (0x131), region = 32 }
   0xc   : > { %v286_v0 = vld [vmem:[%s558_s2] sm:$0xf]  ;;  %v477_v1 = vmov 0   ;;  %v478_v2 = vmov 0.0   ;;  %s566_s15 = smov (!%p224_p4, %s467_s15), 1  ;;  %vm257_vm0 = vcmask 1043456   ;;  %v248_v16 = vlaneseq }
   0xd   : > { %448 = vset.pattern.permute.xlu0 %v477_v1  ;;  %244 = vst [vmem:[#allocation2] sm:$0x1] %v478_v2  ;;  %245 = vst [vmem:[#allocation3] sm:$0x1] %v478_v2  ;;  %s417_s21 = sshll.u32 %s566_s15, 2  ;;  %s232_s27 = scalar_lea.vmem %s557_s1, %s566_s15  ;;  %vm312_vm2 = vcmask 1040384  }
   0xe   : > { %289 = vperm.xlu0 %448, %v286_v0   ;;  %s227_s24 = scalar_lea.vmem %s556_s0, %s417_s21  ;;  %v249_v18 = vshrl.u32 %v248_v16, 7  ;;  %v418_v19 = vld [vmem:[%s232_s27] ss:$0 sm:$0xff]  ;;  %s239_s30 = scalar_lea.vmem %s560_s4, %s566_s15  ;;  %vm316_vm3 = vcmask 0  }
   0xf   : > { %v246_v3 = vld [vmem:[%s227_s24] sm:$0xf]  ;;  %s236_s7 = scalar_lea.vmem %s559_s3, %s566_s15 }
  0x10   : > { %v258_v4 = vsel %vm257_vm0, %v246_v3, -inf  ;;  %vm254_vm1 = vcmp.eq.s32.totalorder %v249_v18, %v418_v19 }
  0x11   : > { %v259_v5 = vrot.slane %v258_v4, 4  ;;  %v419_v22 = vsel %vm254_vm1, 1.0, %v478_v2 }
  0x12   : > { %v278_v24 = vmul.f32 %v419_v22, %v246_v3 }
  0x13   : > { %v260_v6 = vmax.f32 %v258_v4, %v259_v5 }
  0x14   : > { %v279_v26 = vsel %vm257_vm0, %v278_v24, 0.0  ;;  %v305_v45 = vld [vmem:[#allocation3] sm:$0x1]  ;;  %v300_v47 = vld [vmem:[#allocation2] sm:$0x1] }
  0x15   : > { %v261_v7 = vrot.slane %v260_v6, 2  ;;  %v280_v27 = vrot.slane %v279_v26, 4 }
  0x17   : > { %v262_v8 = vmax.f32 %v260_v6, %v261_v7  ;;  %v281_v28 = vadd.f32 %v280_v27, %v279_v26 }
  0x19   : > { %v263_v9 = vrot.slane %v262_v8, 1  ;;  %v282_v29 = vrot.slane %v281_v28, 2 }
  0x1b   : > { %v264_v10 = vmax.f32 %v262_v8, %v263_v9  ;;  %v283_v31 = vadd.f32 %v282_v29, %v281_v28 }
  0x1d   : > { %v265_v11 = vsub.f32 %v246_v3, %v264_v10  ;;  %v284_v36 = vrot.slane %v283_v31, 1 }
  0x1f   : > { %v266_v12 = vmul.f32 1.442695, %v265_v11  ;;  %v285_v40 = vadd.f32 %v284_v36, %v283_v31 }
  0x21   : > { %449 = vpow2.f32 %v266_v12 }
  0x2e   : > { %v450_v13 = vpop.eup %449 }
  0x2f   : > { %v268_v14 = vsel %vm257_vm0, %v450_v13, 0.0 }
  0x30   : > { %v269_v15 = vrot.slane %v268_v14, 4 }
  0x32   : > { %v270_v17 = vadd.f32 %v269_v15, %v268_v14 }
  0x34   : > { %v271_v20 = vrot.slane %v270_v17, 2 }
  0x36   : > { %v272_v21 = vadd.f32 %v271_v20, %v270_v17 }
  0x38   : > { %v273_v23 = vrot.slane %v272_v21, 1 }
  0x3a   : > { %v274_v25 = vadd.f32 %v273_v23, %v272_v21 }
  0x3c   : > { %451 = vlog2.f32 %v274_v25 }
  0x49   : > { %v452_v32 = vpop.eup %451 }
  0x4a   : > { %v276_v35 = vmul.f32 0.6931472, %v452_v32 }
  0x4c   : > { %v277_v39 = vadd.f32 %v276_v35, %v264_v10 }
  0x4e   : > { %v301_v44 = vsub.f32 %v277_v39, %v285_v40 }
  0x89   : > { %v290_v30 = vpop.permute.xlu0 %289 }
  0x8a   : > { %v292_v33 = vmul.f32 %v419_v22, %v290_v30 }
  0x8c   : > { %v293_v34 = vsel %vm257_vm0, %v292_v33, 0.0 }
  0x8d   : > { %v294_v37 = vrot.slane %v293_v34, 4 }
  0x8f   : > { %v295_v38 = vadd.f32 %v294_v37, %v293_v34 }
  0x91   : > { %v296_v41 = vrot.slane %v295_v38, 2 }
  0x93   : > { %v297_v42 = vadd.f32 %v296_v41, %v295_v38 }
  0x95   : > { %v298_v43 = vrot.slane %v297_v42, 1 }
  0x97   : > { %v299_v46 = vadd.f32 %v298_v43, %v297_v42 }
  0x99   : > { %v302_v48 = vmul.f32 %v301_v44, %v299_v46  ;;  %v306_v49 = vadd.f32 %v305_v45, %v299_v46 }
  0x9b   : > { %v303_v50 = vadd.f32 %v302_v48, %v300_v47  ;;  %307 = vst [vmem:[#allocation3] sm:$0x1] %v306_v49 }
  0x9d   : > { %304 = vst [vmem:[#allocation2] sm:$0x1] %v303_v50 }
  0xa2   : > { %v318_v51 = vld [vmem:[#allocation3] sm:$0x1] }
  0xa3   : > { %v319_v52 = vsel %vm312_vm2, %v318_v51, 0.0 }
  0xa4   : > { %320 = vadd.xlane.f32.xlu1 %v319_v52  ;;  %v311_v53 = vld [vmem:[#allocation2] sm:$0x1] }
  0xa5   : > { %v313_v54 = vsel %vm312_vm2, %v311_v53, 0.0 }
  0xa6   : > { %314 = vadd.xlane.f32.xlu0 %v313_v54 }
 0x12d   : > { %v321_v55 = vpop.xlane.xlu1 %320 }
 0x12e   : > { %322 = vst.msk [vmem:[%s239_s30] sm:$0x1] %vm316_vm3, %v321_v55 }
 0x12f   : > { %v315_v56 = vpop.xlane.xlu0 %314 }
 0x130   : > { %317 = vst.msk [vmem:[%s236_s7] sm:$0x1] %vm316_vm3, %v315_v56 }
 0x131 PF: > { %s15_s17 = sadd.s32 1, %s475_s17   ;;  %s561_s15 = smov %s471_s16 }
 0x132   : > { %p12_p5 = scmp.ge.s32.totalorder %s15_s17, 4   ;;  %s562_s16 = smov %s564_s18 }
 0x134   :  { %14 = sbr.rel (!%p12_p5) target bundleno = 2 (0x2), region = 85 }

// kernel: a_call__.3
= control target key start
LH: loop header
LB: loop body
LE: loop exit
PB: predicated region body
PF: predicated region fallthrough
CT: control target
= control target key end

     0   :  { %6 = vsyncpa [#allocation3], 0  ;;  %s870_s0 = inlined_call_operand.hbm [shape: f32[2,64,64], index: 0, kind: input, shape index: {}]   ;;  %s871_s1 = inlined_call_operand.hbm [shape: f32[1,1], index: 1, kind: output, shape index: {}]  }
   0x1   :  { %7 = vsyncpa [#allocation4], 0  ;;  %s672_s6 = smov [#allocation2]  }
   0x2   :  { %s13_s7 = sshll.u32 %s672_s6, 4  ;;  %s14_s7 = int_to_ptr.vmem [resolvable:$true] %s13_s7 }
   0x3   :  { %s636_s8 = scalar_lea.vmem %s14_s7, 2048  ;;  %p641_p1 = scmp.lt.s32.totalorder %s14_s7, %s14_s7 }
   0x4   :  { %p637_p0 = scmp.ne.s32.totalorder %s14_s7, %s636_s8  ;;  %p642_p2 = scmp.lt.s32.totalorder %s636_s8, %s636_s8 }
   0x6   :  { %p643_p3 = por %p642_p2, %p641_p1 }
   0x8   :  { %p644_p4 = pnand %p643_p3, %p637_p0 }
   0xa   :  { %647 = shalt.err (!%p644_p4)
}
   0xb   :  { %s673_s9 = smov 128   ;;  %s674_s10 = smov 8  }
   0xc   :  { %19 = dma.hbm_to_vmem [thread:$0]  %s870_s0, 2048, %s14_s7, [#allocation3], %s673_s9, %s673_s9, %s674_s10  }
   0xd   :  { %668 = dma.done.wait [#allocation3], 2048  }
   0xe   :  { %669 = vsyncadd [#allocation3], 4294965248  ;;  %vm39_vm0 = vcmask 523264   ;;  %v689_v0 = vld [vmem:[#allocation2 + $0x38] sm:$0xff]  ;;  %v693_v2 = vld [vmem:[#allocation2 + $0x30] sm:$0xff]  ;;  %s675_s0 = smov [#allocation5]  }
   0xf   :  { %v691_v1 = vld [vmem:[#allocation2 + $0x78] sm:$0xff]  ;;  %568 = vmatprep.subr.msk.mxu0 %vm39_vm0, %v689_v0  ;;  %v699_v3 = vld [vmem:[#allocation2 + $0x70] sm:$0xff]  ;;  %v709_v4 = vld [vmem:[#allocation2 + $0x28] sm:$0xff]  ;;  %v368_v39 = vmul.f32 %v693_v2, %v693_v2  ;;  %v369_v46 = vmul.f32 %v689_v0, %v689_v0  ;;  %s495_s13 = sshll.u32 %s675_s0, 4  ;;  %vm487_vm1 = vcmask 0   ;;  %s496_s13 = int_to_ptr.vmem [resolvable:$true] %s495_s13 }
  0x10   :  { %596 = vmatprep.subr.msk.mxu1 %vm39_vm0, %v691_v1  ;;  %569 = vmatpush3.xpose.msk.msra.mxu0 %vm39_vm0, %v689_v0  ;;  %v711_v5 = vld [vmem:[#allocation2 + $0x68] sm:$0xff]  ;;  %v715_v7 = vld [vmem:[#allocation2] sm:$0xff]  ;;  %v744_v17 = vld [vmem:[#allocation2 + $0x10] sm:$0xff]  ;;  %v367_v35 = vmul.f32 %v709_v4, %v709_v4  ;;  %v376_v41 = vmul.f32 %v699_v3, %v699_v3  ;;  %v377_v44 = vmul.f32 %v691_v1, %v691_v1  ;;  %s648_s14 = scalar_lea.vmem %s496_s13, 16  ;;  %s652_s15 = scalar_lea.vmem %s496_s13, 32 }
  0x11   :  { %597 = vmatpush3.xpose.msk.msra.mxu1 %vm39_vm0, %v691_v1  ;;  %570 = vmatprep.subr.msk.mxu0 %vm39_vm0, %v693_v2  ;;  %v713_v6 = vld [vmem:[#allocation2 + $0x8] sm:$0xff]  ;;  %v719_v9 = vld [vmem:[#allocation2 + $0x40] sm:$0xff]  ;;  %v362_v10 = vmul.f32 %v715_v7, %v715_v7  ;;  %v749_v19 = vld [vmem:[#allocation2 + $0x50] sm:$0xff]  ;;  %v364_v21 = vmul.f32 %v744_v17, %v744_v17  ;;  %v375_v37 = vmul.f32 %v711_v5, %v711_v5  ;;  %v396_v42 = vsel %vm39_vm0, %v368_v39, 0.0  ;;  %p649_p5 = scmp.ne.s32.totalorder %s496_s13, %s648_s14  ;;  %p653_p6 = scmp.lt.s32.totalorder %s496_s13, %s496_s13 }
  0x12   :  { %598 = vmatprep.subr.msk.mxu1 %vm39_vm0, %v699_v3  ;;  %v717_v8 = vld [vmem:[#allocation2 + $0x48] sm:$0xff]  ;;  %584 = vmatprep.mubr.msk.f32.mxu0 %vm39_vm0, %v715_v7  ;;  %v363_v11 = vmul.f32 %v713_v6, %v713_v6  ;;  %v370_v12 = vmul.f32 %v719_v9, %v719_v9  ;;  %v740_v15 = vld [vmem:[#allocation2 + $0x20] sm:$0xff]  ;;  %v372_v23 = vmul.f32 %v749_v19, %v749_v19  ;;  %v26_v24 = vld [vmem:[#allocation2 + $0x18] sm:$0xff]  ;;  %v393_v38 = vsel %vm39_vm0, %v367_v35, 0.0  ;;  %p654_p7 = scmp.lt.s32.totalorder %s652_s15, %s648_s14 }
  0x13   :  { %v371_v13 = vmul.f32 %v717_v8, %v717_v8  ;;  %v378_v14 = vsel %vm39_vm0, %v362_v10, 0.0  ;;  %v742_v16 = vld [vmem:[#allocation2 + $0x60] sm:$0xff]  ;;  %612 = vmatprep.mubr.msk.f32.mxu1 %vm39_vm0, %v719_v9  ;;  %v34_v25 = vld [vmem:[#allocation2 + $0x58] sm:$0xff]  ;;  %v384_v26 = vsel %vm39_vm0, %v364_v21, 0.0  ;;  %v365_v27 = vmul.f32 %v26_v24, %v26_v24 }
  0x14   :  { %571 = vmatpush3.xpose.msk.msra.mxu0 %vm39_vm0, %v693_v2  ;;  %v402_v18 = vsel %vm39_vm0, %v370_v12, 0.0  ;;  %379 = vadd.xlane.f32.xlu0 %v378_v14  ;;  %v381_v20 = vsel %vm39_vm0, %v363_v11, 0.0  ;;  %v408_v28 = vsel %vm39_vm0, %v372_v23, 0.0  ;;  %v373_v29 = vmul.f32 %v34_v25, %v34_v25  ;;  %p655_p8 = por %p654_p7, %p653_p6 }
  0x15   :  { %599 = vmatpush3.xpose.msk.msra.mxu1 %vm39_vm0, %v699_v3  ;;  %572 = vmatprep.subr.msk.mxu0 %vm39_vm0, %v709_v4  ;;  %v405_v22 = vsel %vm39_vm0, %v371_v13, 0.0  ;;  %v387_v30 = vsel %vm39_vm0, %v365_v27, 0.0  ;;  %v366_v31 = vmul.f32 %v740_v15, %v740_v15  ;;  %v374_v33 = vmul.f32 %v742_v16, %v742_v16 }
  0x16   :  { %600 = vmatprep.subr.msk.mxu1 %vm39_vm0, %v711_v5  ;;  %403 = vadd.xlane.f32.xlu1 %v402_v18  ;;  %v411_v32 = vsel %vm39_vm0, %v373_v29, 0.0  ;;  %v417_v40 = vsel %vm39_vm0, %v375_v37, 0.0  ;;  %v420_v43 = vsel %vm39_vm0, %v376_v41, 0.0  ;;  %v423_v45 = vsel %vm39_vm0, %v377_v44, 0.0  ;;  %p656_p9 = pnand %p655_p8, %p649_p5 }
  0x17   :  { %v390_v34 = vsel %vm39_vm0, %v366_v31, 0.0  ;;  %v414_v36 = vsel %vm39_vm0, %v374_v33, 0.0  ;;  %v399_v47 = vsel %vm39_vm0, %v369_v46, 0.0 }
  0x18   :  { %573 = vmatpush3.xpose.msk.msra.mxu0 %vm39_vm0, %v709_v4  ;;  %382 = vadd.xlane.f32.xlu0 %v381_v20 }
  0x19   :  { %601 = vmatpush3.xpose.msk.msra.mxu1 %vm39_vm0, %v711_v5  ;;  %574 = vmatprep.subr.msk.mxu0 %vm39_vm0, %v740_v15 }
  0x1a   :  { %602 = vmatprep.subr.msk.mxu1 %vm39_vm0, %v742_v16  ;;  %406 = vadd.xlane.f32.xlu1 %v405_v22 }
  0x1c   :  { %575 = vmatpush3.xpose.msk.msra.mxu0 %vm39_vm0, %v740_v15  ;;  %385 = vadd.xlane.f32.xlu0 %v384_v26 }
  0x1d   :  { %603 = vmatpush3.xpose.msk.msra.mxu1 %vm39_vm0, %v742_v16  ;;  %576 = vmatprep.subr.msk.mxu0 %vm39_vm0, %v26_v24 }
  0x1e   :  { %604 = vmatprep.subr.msk.mxu1 %vm39_vm0, %v34_v25  ;;  %409 = vadd.xlane.f32.xlu1 %v408_v28 }
  0x20   :  { %577 = vmatpush3.xpose.msk.msra.mxu0 %vm39_vm0, %v26_v24  ;;  %388 = vadd.xlane.f32.xlu0 %v387_v30 }
  0x21   :  { %605 = vmatpush3.xpose.msk.msra.mxu1 %vm39_vm0, %v34_v25  ;;  %578 = vmatprep.subr.msk.mxu0 %vm39_vm0, %v744_v17 }
  0x22   :  { %606 = vmatprep.subr.msk.mxu1 %vm39_vm0, %v749_v19  ;;  %412 = vadd.xlane.f32.xlu1 %v411_v32 }
  0x24   :  { %579 = vmatpush3.xpose.msk.msra.mxu0 %vm39_vm0, %v744_v17  ;;  %391 = vadd.xlane.f32.xlu0 %v390_v34 }
  0x25   :  { %607 = vmatpush3.xpose.msk.msra.mxu1 %vm39_vm0, %v749_v19  ;;  %580 = vmatprep.subr.msk.mxu0 %vm39_vm0, %v713_v6 }
  0x26   :  { %608 = vmatprep.subr.msk.mxu1 %vm39_vm0, %v717_v8  ;;  %415 = vadd.xlane.f32.xlu1 %v414_v36 }
  0x28   :  { %581 = vmatpush3.xpose.msk.msra.mxu0 %vm39_vm0, %v713_v6  ;;  %394 = vadd.xlane.f32.xlu0 %v393_v38 }
  0x29   :  { %609 = vmatpush3.xpose.msk.msra.mxu1 %vm39_vm0, %v717_v8  ;;  %582 = vmatprep.subr.msk.mxu0 %vm39_vm0, %v715_v7 }
  0x2a   :  { %610 = vmatprep.subr.msk.mxu1 %vm39_vm0, %v719_v9  ;;  %418 = vadd.xlane.f32.xlu1 %v417_v40 }
  0x2c   :  { %583 = vmatpush3.xpose.msk.msra.mxu0 %vm39_vm0, %v715_v7  ;;  %397 = vadd.xlane.f32.xlu0 %v396_v42 }
  0x2d   :  { %611 = vmatpush3.xpose.msk.msra.mxu1 %vm39_vm0, %v719_v9 }
  0x2e   :  { %421 = vadd.xlane.f32.xlu1 %v420_v43 }
  0x2f   :  { %585 = vmatmul.mubr.msk.f32.vlgmr.msra.gmra.mxu0 %vm39_vm0, %v713_v6 }
  0x30   :  { %613 = vmatmul.mubr.msk.f32.vlgmr.msra.gmra.mxu1 %vm39_vm0, %v717_v8  ;;  %587 = vmatprep.mubr.msk.f32.mxu0 %vm39_vm0, %v744_v17 }
  0x31   :  { %615 = vmatprep.mubr.msk.f32.mxu1 %vm39_vm0, %v749_v19  ;;  %400 = vadd.xlane.f32.xlu0 %v399_v47 }
  0x32   :  { %424 = vadd.xlane.f32.xlu1 %v423_v45 }
  0x33   :  { %588 = vmatmul.mubr.msk.f32.gmra.mxu0 %vm39_vm0, %v26_v24 }
  0x34   :  { %616 = vmatmul.mubr.msk.f32.gmra.mxu1 %vm39_vm0, %v34_v25  ;;  %590 = vmatprep.mubr.msk.f32.mxu0 %vm39_vm0, %v740_v15 }
  0x35   :  { %618 = vmatprep.mubr.msk.f32.mxu1 %vm39_vm0, %v742_v16 }
  0x37   :  { %591 = vmatmul.mubr.msk.f32.gmra.mxu0 %vm39_vm0, %v709_v4 }
  0x38   :  { %619 = vmatmul.mubr.msk.f32.gmra.mxu1 %vm39_vm0, %v711_v5  ;;  %593 = vmatprep.mubr.msk.f32.mxu0 %vm39_vm0, %v693_v2 }
  0x39   :  { %621 = vmatprep.mubr.msk.f32.mxu1 %vm39_vm0, %v699_v3 }
  0x3b   :  { %594 = vmatmul.mubr.msk.f32.gmra.mxu0 %vm39_vm0, %v689_v0 }
  0x3c   :  { %622 = vmatmul.mubr.msk.f32.gmra.mxu1 %vm39_vm0, %v691_v1 }
  0x9d   :  { %v380_v33 = vpop.xlane.xlu0 %379 }
  0x9f   :  { %v404_v32 = vpop.xlane.xlu1 %403 }
  0xa1   :  { %v383_v35 = vpop.xlane.xlu0 %382 }
  0xa3   :  { %v407_v34 = vpop.xlane.xlu1 %406 }
  0xa5   :  { %v386_v37 = vpop.xlane.xlu0 %385 }
  0xa7   :  { %v410_v36 = vpop.xlane.xlu1 %409 }
  0xa9   :  { %v389_v39 = vpop.xlane.xlu0 %388 }
  0xab   :  { %v413_v38 = vpop.xlane.xlu1 %412 }
  0xad   :  { %v392_v41 = vpop.xlane.xlu0 %391 }
  0xaf   :  { %v416_v40 = vpop.xlane.xlu1 %415 }
  0xb1   :  { %v395_v43 = vpop.xlane.xlu0 %394 }
  0xb3   :  { %v419_v42 = vpop.xlane.xlu1 %418 }
  0xb5   :  { %v398_v45 = vpop.xlane.xlu0 %397 }
  0xb7   :  { %v422_v44 = vpop.xlane.xlu1 %421 }
  0xba   :  { %v401_v47 = vpop.xlane.xlu0 %400 }
  0xbb   :  { %v425_v46 = vpop.xlane.xlu1 %424 }
  0xef   :  { %v586_v48 = vpop.f32.mrf.mxu0 }
  0xf0   :  { %v614_v49 = vpop.f32.mrf.mxu1  ;;  %v299_v50 = vmul.f32 %v586_v48, %v586_v48 }
  0xf1   :  { %v307_v51 = vmul.f32 %v614_v49, %v614_v49  ;;  %v130_v52 = vpop.f32.mrf.mxu0 }
  0xf2   :  { %v259_v53 = vpop.f32.mrf.mxu1  ;;  %v298_v54 = vmul.f32 %v130_v52, %v130_v52  ;;  %v317_v55 = vsel %vm39_vm0, %v299_v50, 0.0 }
  0xf3   :  { %318 = vadd.xlane.f32.xlu1 %v317_v55  ;;  %v306_v57 = vmul.f32 %v259_v53, %v259_v53  ;;  %v341_v60 = vsel %vm39_vm0, %v307_v51, 0.0  ;;  %v589_v61 = vpop.f32.mrf.mxu0  ;;  %v434_v53 = vmul.f32 2.0, %v404_v32  ;;  %v426_v55 = vmul.f32 2.0, %v380_v33 }
  0xf4   :  { %v617_v56 = vpop.f32.mrf.mxu1  ;;  %v314_v58 = vsel %vm39_vm0, %v298_v54, 0.0  ;;  %v301_v63 = vmul.f32 %v589_v61, %v589_v61  ;;  %v428_v61 = vmul.f32 2.0, %v386_v37 }
  0xf5   :  { %v309_v59 = vmul.f32 %v617_v56, %v617_v56  ;;  %315 = vadd.xlane.f32.xlu0 %v314_v58  ;;  %v338_v1 = vsel %vm39_vm0, %v306_v57, 0.0  ;;  %v140_v3 = vpop.f32.mrf.mxu0  ;;  %v435_v56 = vmul.f32 2.0, %v407_v34  ;;  %v436_v57 = vmul.f32 2.0, %v410_v36 }
  0xf6   :  { %v269_v62 = vpop.f32.mrf.mxu1  ;;  %v323_v5 = vsel %vm39_vm0, %v301_v63, 0.0  ;;  %v300_v8 = vmul.f32 %v140_v3, %v140_v3  ;;  %v441_v34 = vmul.f32 2.0, %v425_v46 }
  0xf7   :  { %342 = vadd.xlane.f32.xlu1 %v341_v60  ;;  %v347_v2 = vsel %vm39_vm0, %v309_v59, 0.0  ;;  %v308_v4 = vmul.f32 %v269_v62, %v269_v62  ;;  %v592_v6 = vpop.f32.mrf.mxu0  ;;  %v427_v59 = vmul.f32 2.0, %v383_v35 }
  0xf8   :  { %v620_v0 = vpop.f32.mrf.mxu1  ;;  %v303_v12 = vmul.f32 %v592_v6, %v592_v6  ;;  %v320_v14 = vsel %vm39_vm0, %v300_v8, 0.0  ;;  %v437_v6 = vmul.f32 2.0, %v413_v38  ;;  %v433_v38 = vmul.f32 2.0, %v401_v47 }
  0xf9   :  { %339 = vadd.xlane.f32.xlu0 %v338_v1  ;;  %v311_v9 = vmul.f32 %v620_v0, %v620_v0  ;;  %v344_v11 = vsel %vm39_vm0, %v308_v4, 0.0  ;;  %v150_v13 = vpop.f32.mrf.mxu0 }
  0xfa   :  { %v279_v7 = vpop.f32.mrf.mxu1  ;;  %v329_v19 = vsel %vm39_vm0, %v303_v12, 0.0  ;;  %v302_v20 = vmul.f32 %v150_v13, %v150_v13 }
  0xfb   :  { %348 = vadd.xlane.f32.xlu1 %v347_v2  ;;  %v353_v15 = vsel %vm39_vm0, %v311_v9, 0.0  ;;  %v595_v16 = vpop.f32.mrf.mxu0  ;;  %v310_v18 = vmul.f32 %v279_v7, %v279_v7 }
  0xfc   :  { %v623_v10 = vpop.f32.mrf.mxu1  ;;  %v326_v25 = vsel %vm39_vm0, %v302_v20, 0.0  ;;  %v305_v28 = vmul.f32 %v595_v16, %v595_v16  ;;  %v439_v16 = vmul.f32 2.0, %v419_v42  ;;  %v431_v20 = vmul.f32 2.0, %v395_v43 }
  0xfd   :  { %324 = vadd.xlane.f32.xlu0 %v323_v5  ;;  %v160_v22 = vpop.f32.mrf.mxu0  ;;  %v350_v23 = vsel %vm39_vm0, %v310_v18, 0.0  ;;  %v313_v27 = vmul.f32 %v623_v10, %v623_v10  ;;  %v429_v10 = vmul.f32 2.0, %v389_v39 }
  0xfe   :  { %v289_v17 = vpop.f32.mrf.mxu1  ;;  %v304_v24 = vmul.f32 %v160_v22, %v160_v22  ;;  %v335_v31 = vsel %vm39_vm0, %v305_v28, 0.0 }
  0xff   :  { %345 = vadd.xlane.f32.xlu1 %v344_v11  ;;  %v312_v21 = vmul.f32 %v289_v17, %v289_v17  ;;  %v359_v30 = vsel %vm39_vm0, %v313_v27, 0.0  ;;  %v438_v11 = vmul.f32 2.0, %v416_v40  ;;  %v432_v27 = vmul.f32 2.0, %v398_v45 }
 0x100   :  { %v332_v29 = vsel %vm39_vm0, %v304_v24, 0.0 }
 0x101   :  { %321 = vadd.xlane.f32.xlu0 %v320_v14  ;;  %v356_v26 = vsel %vm39_vm0, %v312_v21, 0.0  ;;  %v430_v14 = vmul.f32 2.0, %v392_v41  ;;  %v440_v21 = vmul.f32 2.0, %v422_v44 }
 0x103   :  { %354 = vadd.xlane.f32.xlu1 %v353_v15 }
 0x105   :  { %330 = vadd.xlane.f32.xlu0 %v329_v19 }
 0x107   :  { %351 = vadd.xlane.f32.xlu1 %v350_v23 }
 0x109   :  { %327 = vadd.xlane.f32.xlu0 %v326_v25 }
 0x10b   :  { %357 = vadd.xlane.f32.xlu1 %v356_v26 }
 0x10d   :  { %333 = vadd.xlane.f32.xlu0 %v332_v29 }
 0x10f   :  { %360 = vadd.xlane.f32.xlu1 %v359_v30 }
 0x111   :  { %336 = vadd.xlane.f32.xlu0 %v335_v31 }
 0x17c   :  { %v319_v48 = vpop.xlane.xlu1 %318 }
 0x17d   :  { %v443_v2 = vsub.f32 %v319_v48, %v427_v59 }
 0x17e   :  { %v316_v49 = vpop.xlane.xlu0 %315 }
 0x17f   :  { %v442_v62 = vsub.f32 %v316_v49, %v426_v55 }
 0x180   :  { %v343_v50 = vpop.xlane.xlu1 %342 }
 0x181   :  { %v451_v63 = vsub.f32 %v343_v50, %v435_v56  ;;  %v458_v7 = vadd.f32 %v443_v2, %v442_v62 }
 0x182   :  { %v340_v51 = vpop.xlane.xlu0 %339 }
 0x183   :  { %v450_v58 = vsub.f32 %v340_v51, %v434_v53 }
 0x184   :  { %v349_v52 = vpop.xlane.xlu1 %348 }
 0x185   :  { %v471_v3 = vadd.f32 %v451_v63, %v450_v58  ;;  %v453_v12 = vsub.f32 %v349_v52, %v437_v6 }
 0x186   :  { %v325_v54 = vpop.xlane.xlu0 %324 }
 0x187   :  { %v445_v17 = vsub.f32 %v325_v54, %v429_v10 }
 0x188   :  { %v346_v60 = vpop.xlane.xlu1 %345 }
 0x189   :  { %v452_v0 = vsub.f32 %v346_v60, %v436_v57 }
 0x18a   :  { %v322_v1 = vpop.xlane.xlu0 %321 }
 0x18b   :  { %v444_v4 = vsub.f32 %v322_v1, %v428_v61  ;;  %v472_v8 = vadd.f32 %v471_v3, %v452_v0 }
 0x18c   :  { %v355_v5 = vpop.xlane.xlu1 %354 }
 0x18d   :  { %v459_v13 = vadd.f32 %v458_v7, %v444_v4  ;;  %v473_v19 = vadd.f32 %v472_v8, %v453_v12  ;;  %v455_v23 = vsub.f32 %v355_v5, %v439_v16 }
 0x18e   :  { %v331_v9 = vpop.xlane.xlu0 %330 }
 0x18f   :  { %v460_v25 = vadd.f32 %v459_v13, %v445_v17  ;;  %v447_v29 = vsub.f32 %v331_v9, %v431_v20 }
 0x190   :  { %v352_v15 = vpop.xlane.xlu1 %351 }
 0x191   :  { %v454_v18 = vsub.f32 %v352_v15, %v438_v11 }
 0x192   :  { %v328_v22 = vpop.xlane.xlu0 %327 }
 0x193   :  { %v474_v24 = vadd.f32 %v473_v19, %v454_v18  ;;  %v446_v26 = vsub.f32 %v328_v22, %v430_v14 }
 0x194   :  { %v358_v28 = vpop.xlane.xlu1 %357 }
 0x195   :  { %v461_v30 = vadd.f32 %v460_v25, %v446_v26  ;;  %v456_v31 = vsub.f32 %v358_v28, %v440_v21  ;;  %v475_v32 = vadd.f32 %v474_v24, %v455_v23 }
 0x196   :  { %v334_v33 = vpop.xlane.xlu0 %333 }
 0x197   :  { %v462_v35 = vadd.f32 %v461_v30, %v447_v29  ;;  %v448_v36 = vsub.f32 %v334_v33, %v432_v27  ;;  %v476_v39 = vadd.f32 %v475_v32, %v456_v31 }
 0x198   :  { %v361_v37 = vpop.xlane.xlu1 %360 }
 0x199   :  { %v457_v40 = vsub.f32 %v361_v37, %v441_v34  ;;  %v463_v42 = vadd.f32 %v462_v35, %v448_v36 }
 0x19a   :  { %v337_v41 = vpop.xlane.xlu0 %336 }
 0x19b   :  { %v477_v43 = vadd.f32 %v476_v39, %v457_v40  ;;  %v449_v44 = vsub.f32 %v337_v41, %v433_v38 }
 0x19d   :  { %v478_v48 = vrot.slane %v477_v43, 4  ;;  %v464_v49 = vadd.f32 %v463_v42, %v449_v44 }
 0x19f   :  { %v479_v45 = vadd.f32 %v478_v48, %v477_v43  ;;  %v465_v50 = vrot.slane %v464_v49, 4 }
 0x1a1   :  { %v480_v51 = vrot.slane %v479_v45, 2  ;;  %v466_v52 = vadd.f32 %v465_v50, %v464_v49 }
 0x1a3   :  { %v481_v53 = vadd.f32 %v480_v51, %v479_v45  ;;  %v467_v54 = vrot.slane %v466_v52, 2 }
 0x1a5   :  { %v482_v55 = vrot.slane %v481_v53, 1  ;;  %v468_v46 = vadd.f32 %v467_v54, %v466_v52 }
 0x1a7   :  { %v469_v56 = vrot.slane %v468_v46, 1  ;;  %v483_v57 = vadd.f32 %v482_v55, %v481_v53 }
 0x1a9   :  { %v470_v58 = vadd.f32 %v469_v56, %v468_v46 }
 0x1ab   :  { %v484_v47 = vadd.f32 %v483_v57, %v470_v58 }
 0x1ad   :  { %v485_v59 = vmul.f32 0.5, %v484_v47 }
 0x1af   :  { %v486_v60 = vadd.f32 64.0, %v485_v59 }
 0x1b1   :  { %488 = vst.msk [vmem:[#allocation5] sm:$0x1] %vm487_vm1, %v486_v60 }
 0x1b2   :  { %659 = shalt.err (!%p656_p9)
}
 0x1b3   :  { %498 = dma.vmem_to_hbm [thread:$0]  %s496_s13, 16, %s871_s1, [#allocation4]  }
 0x1b4   :  { %670 = dma.done.wait [#allocation4], 16  }
 0x1b5   :  { %671 = vsyncadd [#allocation4], 4294967280 }
 0x1b6   :  { %502 = vsyncpa [#allocation3], 1 }
 0x1b7   :  { %503 = vsyncpa [#allocation4], 1 }

</bundles_post_ra>
